<compile_context>
chip_gen: v6e
topology: v6e:2x2x1
jax: 0.10.0
libtpu: 0.0.40
codegen_flags: <defaults>
</compile_context>

<pallas_src>
import functools

import jax
import jax.numpy as jnp
from jax import lax
from jax.experimental import pallas as pl
from jax.experimental.pallas import tpu as pltpu


def _feature_tokenizer_kernel(
    x_num_ref,    # (Bt, Fn)     f32  batch tile
    x_cat_ref,    # (Bt, Fc)     i32  batch tile
    w_ref,        # (Fn, D)      f32  resident
    b_ref,        # (Fn, D)      f32  resident
    emb_ref,      # (V,  D)      f32  resident flat embedding table
    cbias_ref,    # (Fc, D)      f32  resident
    num_out_ref,  # (Bt, Fn*D)   f32  lane-flattened numerical tokens
    cat_out_ref,  # (Bt, Fc*D)   f32  lane-flattened categorical tokens
    *,
    cardinalities,
    d_token,
):
    D = d_token

    # ---------------- numerical tokens: w[f] * x[:, f] + b[f] ----------------
    x_num = x_num_ref[...]                       # (Bt, Fn)
    w = w_ref[...]                               # (Fn, D)
    b = b_ref[...]                               # (Fn, D)
    Fn = w.shape[0]
    num_cols = []
    for f in range(Fn):                          # static, Fn is small
        col = x_num[:, f:f + 1] * w[f:f + 1, :] + b[f:f + 1, :]   # (Bt, D)
        num_cols.append(col)
    num_out_ref[...] = (
        num_cols[0] if Fn == 1 else jnp.concatenate(num_cols, axis=1)
    )

    # ------------- categorical tokens: per-feature one-hot gather -------------
    # For feature j with cardinality card_j, the embedding rows live in the
    # static slice emb[off_j : off_j + card_j].  one-hot (Bt, card_j) @ slice
    # keeps the MXU contraction at K = card_j (not K = V) and needs no offset
    # arithmetic at run time.
    x_cat = x_cat_ref[...]                       # (Bt, Fc) int32
    cbias = cbias_ref[...]                       # (Fc, D)
    Bt = x_cat.shape[0]
    cat_cols = []
    offset = 0
    for j, card in enumerate(cardinalities):     # static, Fc is small
        ids = x_cat[:, j:j + 1]                                   # (Bt, 1)
        iota = lax.broadcasted_iota(jnp.int32, (Bt, card), 1)     # (Bt, card)
        onehot = (ids == iota).astype(jnp.float32)                # (Bt, card)
        emb_j = emb_ref[offset:offset + card, :]                  # (card, D) static
        tok = jnp.dot(onehot, emb_j, preferred_element_type=jnp.float32)  # (Bt, D)
        cat_cols.append(tok + cbias[j:j + 1, :])
        offset += card
    cat_out_ref[...] = (
        cat_cols[0] if len(cat_cols) == 1 else jnp.concatenate(cat_cols, axis=1)
    )


def feature_tokenizer(x_num, x_cat, params, cat_cardinalities, *, b_tile=None):
    """Runs the FeatureTokenizer forward as one batch-tiled Pallas call."""
    w = params["num_weight"]        # (Fn, D)
    b = params["num_bias"]          # (Fn, D)
    emb = params["emb_weight"]      # (V, D)
    cbias = params["cat_bias"]      # (Fc, D)

    B, Fn = x_num.shape
    _, Fc = x_cat.shape
    D = w.shape[1]
    V = emb.shape[0]
    assert Fc == len(cat_cardinalities)
    assert V == sum(cat_cardinalities)

    # Batch tile: full batch if small, otherwise a multiple of 8 (sublane tile).
    if b_tile is None:
        b_tile = B if B <= 1024 else 1024
    if b_tile != B and b_tile % 8 != 0:
        b_tile = max(8, (b_tile // 8) * 8)
    grid = (pl.cdiv(B, b_tile),)

    x_cat = x_cat.astype(jnp.int32)

    kernel = functools.partial(
        _feature_tokenizer_kernel,
        cardinalities=tuple(int(c) for c in cat_cardinalities),
        d_token=D,
    )

    # VMEM budget: resident tables + double-buffered per-tile inputs/outputs.
    resident = emb.nbytes + w.nbytes + b.nbytes + cbias.nbytes
    per_tile = 4 * b_tile * (Fn + Fc + Fn * D + Fc * D)
    vmem_limit = int(
        min(max(2 * (resident + 2 * per_tile) + (4 << 20), 32 << 20), 64 << 20)
    )

    num_out, cat_out = pl.pallas_call(
        kernel,
        grid_spec=pltpu.PrefetchScalarGridSpec(
            num_scalar_prefetch=0,
            grid=grid,
            in_specs=[
                pl.BlockSpec((b_tile, Fn), lambda i: (i, 0)),   # x_num tile
                pl.BlockSpec((b_tile, Fc), lambda i: (i, 0)),   # x_cat tile
                pl.BlockSpec((Fn, D), lambda i: (0, 0)),        # num weight (resident)
                pl.BlockSpec((Fn, D), lambda i: (0, 0)),        # num bias   (resident)
                pl.BlockSpec((V, D), lambda i: (0, 0)),         # emb table  (resident)
                pl.BlockSpec((Fc, D), lambda i: (0, 0)),        # cat bias   (resident)
            ],
            out_specs=[
                pl.BlockSpec((b_tile, Fn * D), lambda i: (i, 0)),
                pl.BlockSpec((b_tile, Fc * D), lambda i: (i, 0)),
            ],
        ),
        out_shape=(
            jax.ShapeDtypeStruct((B, Fn * D), jnp.float32),
            jax.ShapeDtypeStruct((B, Fc * D), jnp.float32),
        ),
        compiler_params=pltpu.CompilerParams(
            dimension_semantics=("parallel",),
            vmem_limit_bytes=vmem_limit,
        ),
    )(x_num, x_cat, w, b, emb, cbias)

    # Free layout plumbing in the wrapper: (B, F*D) -> (B, F, D), then concat
    # along the token axis exactly like torch.cat([num_tok, cat_tok], dim=1).
    num_tok = num_out.reshape(B, Fn, D)
    cat_tok = cat_out.reshape(B, Fc, D)
    return jnp.concatenate([num_tok, cat_tok], axis=1)


def make_params(key, n_num_features, cat_cardinalities, d_token):
    """'uniform' init as in the paper: U(-d^-0.5, d^-0.5)."""
    s = d_token ** -0.5
    k = jax.random.split(key, 4)
    Fn = n_num_features
    Fc = len(cat_cardinalities)
    V = sum(cat_cardinalities)
    return {
        "num_weight": jax.random.uniform(k[0], (Fn, d_token), jnp.float32, -s, s),
        "num_bias":   jax.random.uniform(k[1], (Fn, d_token), jnp.float32, -s, s),
        "emb_weight": jax.random.uniform(k[2], (V, d_token), jnp.float32, -s, s),
        "cat_bias":   jax.random.uniform(k[3], (Fc, d_token), jnp.float32, -s, s),
        # Offsets are only needed by the plain-JAX reference; the kernel bakes
        # them in statically via per-feature embedding-table slices.
        "cat_offsets": jnp.cumsum(
            jnp.asarray([0] + list(cat_cardinalities[:-1]), jnp.int32)
        )[None, :],
    }


def feature_tokenizer_ref(x_num, x_cat, params):
    """Plain-JAX reference mirroring the PyTorch forward."""
    num_tok = params["num_weight"][None] * x_num[..., None] + params["num_bias"][None]
    idx = x_cat.astype(jnp.int32) + params["cat_offsets"]
    cat_tok = params["emb_weight"][idx] + params["cat_bias"][None]
    return jnp.concatenate([num_tok, cat_tok], axis=1)


if __name__ == "__main__":
    # Small shapes consistent with the module's forward; B=16 with b_tile=8
    # exercises the batch grid (2 pipelined grid steps).
    B = 16
    n_num_features = 3
    cat_cardinalities = [3, 5]
    d_token = 32

    key = jax.random.PRNGKey(0)
    k_p, k_num, k_cat = jax.random.split(key, 3)

    params = make_params(k_p, n_num_features, cat_cardinalities, d_token)

    x_num = jax.random.normal(k_num, (B, n_num_features), jnp.float32)
    maxes = jnp.asarray(cat_cardinalities, jnp.int32)[None, :]
    x_cat = (
        jax.random.randint(k_cat, (B, len(cat_cardinalities)), 0, 10 ** 6) % maxes
    ).astype(jnp.int32)

    out = feature_tokenizer(x_num, x_cat, params, cat_cardinalities, b_tile=8)
    out = jax.block_until_ready(out)

    ref = feature_tokenizer_ref(x_num, x_cat, params)
    assert out.shape == (B, n_num_features + len(cat_cardinalities), d_token)
    assert jnp.allclose(out, ref, atol=1e-5, rtol=1e-5), "mismatch vs reference"

    print("KERNEL_OK")
</pallas_src>

<mosaic_0001>
module attributes {stable_mosaic.version = 11 : i64} {
  func.func @_feature_tokenizer_kernel(%arg0: i32, %arg1: memref<8x3xf32, #tpu.memory_space<vmem>>, %arg2: memref<8x2xi32, #tpu.memory_space<vmem>>, %arg3: memref<3x32xf32, #tpu.memory_space<vmem>>, %arg4: memref<3x32xf32, #tpu.memory_space<vmem>>, %arg5: memref<8x32xf32, #tpu.memory_space<vmem>>, %arg6: memref<2x32xf32, #tpu.memory_space<vmem>>, %arg7: memref<8x96xf32, #tpu.memory_space<vmem>>, %arg8: memref<8x64xf32, #tpu.memory_space<vmem>>) attributes {dimension_semantics = [#tpu.dimension_semantics<parallel>], iteration_bounds = array<i64: 2>, scalar_prefetch = 0 : i64, scratch_operands = 0 : i64, tpu.core_type = #tpu.core_type<tc>, window_params = [{transform_indices = @transform_0, window_bounds = array<i64: 8, 3>}, {transform_indices = @transform_1, window_bounds = array<i64: 8, 2>}, {pipeline_mode = #tpu.pipeline_mode<synchronous>, transform_indices = @transform_2, window_bounds = array<i64: 3, 32>}, {pipeline_mode = #tpu.pipeline_mode<synchronous>, transform_indices = @transform_3, window_bounds = array<i64: 3, 32>}, {pipeline_mode = #tpu.pipeline_mode<synchronous>, transform_indices = @transform_4, window_bounds = array<i64: 8, 32>}, {pipeline_mode = #tpu.pipeline_mode<synchronous>, transform_indices = @transform_5, window_bounds = array<i64: 2, 32>}, {transform_indices = @transform_6, window_bounds = array<i64: 8, 96>}, {transform_indices = @transform_7, window_bounds = array<i64: 8, 64>}]} {
    %c0 = arith.constant 0 : index
    %c0_0 = arith.constant 0 : index
    %0 = vector.load %arg1[%c0, %c0_0] : memref<8x3xf32, #tpu.memory_space<vmem>>, vector<8x3xf32>
    %c0_1 = arith.constant 0 : index
    %c0_2 = arith.constant 0 : index
    %1 = vector.load %arg3[%c0_1, %c0_2] : memref<3x32xf32, #tpu.memory_space<vmem>>, vector<3x32xf32>
    %c0_3 = arith.constant 0 : index
    %c0_4 = arith.constant 0 : index
    %2 = vector.load %arg4[%c0_3, %c0_4] : memref<3x32xf32, #tpu.memory_space<vmem>>, vector<3x32xf32>
    %3 = vector.extract_strided_slice %0 {offsets = [0, 0], sizes = [8, 1], strides = [1, 1]} : vector<8x3xf32> to vector<8x1xf32>
    %4 = vector.extract_strided_slice %1 {offsets = [0, 0], sizes = [1, 32], strides = [1, 1]} : vector<3x32xf32> to vector<1x32xf32>
    %5 = vector.broadcast %3 : vector<8x1xf32> to vector<8x32xf32>
    %6 = vector.broadcast %4 : vector<1x32xf32> to vector<8x32xf32>
    %7 = arith.mulf %5, %6 : vector<8x32xf32>
    %8 = vector.extract_strided_slice %2 {offsets = [0, 0], sizes = [1, 32], strides = [1, 1]} : vector<3x32xf32> to vector<1x32xf32>
    %9 = vector.broadcast %8 : vector<1x32xf32> to vector<8x32xf32>
    %10 = arith.addf %7, %9 : vector<8x32xf32>
    %11 = vector.extract_strided_slice %0 {offsets = [0, 1], sizes = [8, 1], strides = [1, 1]} : vector<8x3xf32> to vector<8x1xf32>
    %12 = vector.extract_strided_slice %1 {offsets = [1, 0], sizes = [1, 32], strides = [1, 1]} : vector<3x32xf32> to vector<1x32xf32>
    %13 = vector.broadcast %11 : vector<8x1xf32> to vector<8x32xf32>
    %14 = vector.broadcast %12 : vector<1x32xf32> to vector<8x32xf32>
    %15 = arith.mulf %13, %14 : vector<8x32xf32>
    %16 = vector.extract_strided_slice %2 {offsets = [1, 0], sizes = [1, 32], strides = [1, 1]} : vector<3x32xf32> to vector<1x32xf32>
    %17 = vector.broadcast %16 : vector<1x32xf32> to vector<8x32xf32>
    %18 = arith.addf %15, %17 : vector<8x32xf32>
    %19 = vector.extract_strided_slice %0 {offsets = [0, 2], sizes = [8, 1], strides = [1, 1]} : vector<8x3xf32> to vector<8x1xf32>
    %20 = vector.extract_strided_slice %1 {offsets = [2, 0], sizes = [1, 32], strides = [1, 1]} : vector<3x32xf32> to vector<1x32xf32>
    %21 = vector.broadcast %19 : vector<8x1xf32> to vector<8x32xf32>
    %22 = vector.broadcast %20 : vector<1x32xf32> to vector<8x32xf32>
    %23 = arith.mulf %21, %22 : vector<8x32xf32>
    %24 = vector.extract_strided_slice %2 {offsets = [2, 0], sizes = [1, 32], strides = [1, 1]} : vector<3x32xf32> to vector<1x32xf32>
    %25 = vector.broadcast %24 : vector<1x32xf32> to vector<8x32xf32>
    %26 = arith.addf %23, %25 : vector<8x32xf32>
    %27 = tpu.concatenate %10, %18, %26 in 1 : vector<8x32xf32>, vector<8x32xf32>, vector<8x32xf32> -> vector<8x96xf32>
    %c0_5 = arith.constant 0 : index
    %c0_6 = arith.constant 0 : index
    %28 = vector.load %arg7[%c0_5, %c0_6] : memref<8x96xf32, #tpu.memory_space<vmem>>, vector<8x96xf32>
    tpu.vector_store %arg7[%c0_5, %c0_6], %27 {strides = array<i32>} : memref<8x96xf32, #tpu.memory_space<vmem>>, vector<8x96xf32>,
    %c0_7 = arith.constant 0 : index
    %c0_8 = arith.constant 0 : index
    %29 = vector.load %arg2[%c0_7, %c0_8] : memref<8x2xi32, #tpu.memory_space<vmem>>, vector<8x2xi32>
    %c0_9 = arith.constant 0 : index
    %c0_10 = arith.constant 0 : index
    %30 = vector.load %arg6[%c0_9, %c0_10] : memref<2x32xf32, #tpu.memory_space<vmem>>, vector<2x32xf32>
    %31 = vector.extract_strided_slice %29 {offsets = [0, 0], sizes = [8, 1], strides = [1, 1]} : vector<8x2xi32> to vector<8x1xi32>
    %32 = tpu.iota {dimensions = array<i32: 1>} : vector<8x3xi32>
    %33 = vector.broadcast %31 : vector<8x1xi32> to vector<8x3xi32>
    %34 = arith.cmpi eq, %33, %32 : vector<8x3xi32>
    %35 = arith.extui %34 : vector<8x3xi1> to vector<8x3xi32>
    %36 = arith.sitofp %35 : vector<8x3xi32> to vector<8x3xf32>
    %c0_11 = arith.constant 0 : index
    %c0_12 = arith.constant 0 : index
    %37 = vector.load %arg5[%c0_11, %c0_12] : memref<8x32xf32, #tpu.memory_space<vmem>>, vector<3x32xf32>
    %cst = arith.constant dense<0.000000e+00> : vector<8x32xf32>
    %38 = tpu.matmul %36, %37, %cst {dimension_numbers = #tpu.dot_dimension_numbers<[1], [0], [0], [1], [0, 0, 1, 1], [], []>} : vector<8x3xf32>, vector<3x32xf32>, vector<8x32xf32> -> vector<8x32xf32>
    %39 = vector.extract_strided_slice %30 {offsets = [0, 0], sizes = [1, 32], strides = [1, 1]} : vector<2x32xf32> to vector<1x32xf32>
    %40 = vector.broadcast %39 : vector<1x32xf32> to vector<8x32xf32>
    %41 = arith.addf %38, %40 : vector<8x32xf32>
    %42 = vector.extract_strided_slice %29 {offsets = [0, 1], sizes = [8, 1], strides = [1, 1]} : vector<8x2xi32> to vector<8x1xi32>
    %43 = tpu.iota {dimensions = array<i32: 1>} : vector<8x5xi32>
    %44 = vector.broadcast %42 : vector<8x1xi32> to vector<8x5xi32>
    %45 = arith.cmpi eq, %44, %43 : vector<8x5xi32>
    %46 = arith.extui %45 : vector<8x5xi1> to vector<8x5xi32>
    %47 = arith.sitofp %46 : vector<8x5xi32> to vector<8x5xf32>
    %c3 = arith.constant 3 : index
    %c0_13 = arith.constant 0 : index
    %48 = vector.load %arg5[%c3, %c0_13] : memref<8x32xf32, #tpu.memory_space<vmem>>, vector<5x32xf32>
    %cst_14 = arith.constant dense<0.000000e+00> : vector<8x32xf32>
    %49 = tpu.matmul %47, %48, %cst_14 {dimension_numbers = #tpu.dot_dimension_numbers<[1], [0], [0], [1], [0, 0, 1, 1], [], []>} : vector<8x5xf32>, vector<5x32xf32>, vector<8x32xf32> -> vector<8x32xf32>
    %50 = vector.extract_strided_slice %30 {offsets = [1, 0], sizes = [1, 32], strides = [1, 1]} : vector<2x32xf32> to vector<1x32xf32>
    %51 = vector.broadcast %50 : vector<1x32xf32> to vector<8x32xf32>
    %52 = arith.addf %49, %51 : vector<8x32xf32>
    %53 = tpu.concatenate %41, %52 in 1 : vector<8x32xf32>, vector<8x32xf32> -> vector<8x64xf32>
    %c0_15 = arith.constant 0 : index
    %c0_16 = arith.constant 0 : index
    %54 = vector.load %arg8[%c0_15, %c0_16] : memref<8x64xf32, #tpu.memory_space<vmem>>, vector<8x64xf32>
    tpu.vector_store %arg8[%c0_15, %c0_16], %53 {strides = array<i32>} : memref<8x64xf32, #tpu.memory_space<vmem>>, vector<8x64xf32>,
    return
  }
  func.func @transform_0(%arg0: i32) -> (i32, i32) {
    %c0_i32 = arith.constant 0 : i32
    %c0_i32_0 = arith.constant 0 : i32
    return %arg0, %c0_i32 : i32, i32
  }
  func.func @transform_1(%arg0: i32) -> (i32, i32) {
    %c0_i32 = arith.constant 0 : i32
    %c0_i32_0 = arith.constant 0 : i32
    return %arg0, %c0_i32 : i32, i32
  }
  func.func @transform_2(%arg0: i32) -> (i32, i32) {
    %c0_i32 = arith.constant 0 : i32
    %c0_i32_0 = arith.constant 0 : i32
    %c0_i32_1 = arith.constant 0 : i32
    return %c0_i32, %c0_i32_0 : i32, i32
  }
  func.func @transform_3(%arg0: i32) -> (i32, i32) {
    %c0_i32 = arith.constant 0 : i32
    %c0_i32_0 = arith.constant 0 : i32
    %c0_i32_1 = arith.constant 0 : i32
    return %c0_i32, %c0_i32_0 : i32, i32
  }
  func.func @transform_4(%arg0: i32) -> (i32, i32) {
    %c0_i32 = arith.constant 0 : i32
    %c0_i32_0 = arith.constant 0 : i32
    %c0_i32_1 = arith.constant 0 : i32
    return %c0_i32, %c0_i32_0 : i32, i32
  }
  func.func @transform_5(%arg0: i32) -> (i32, i32) {
    %c0_i32 = arith.constant 0 : i32
    %c0_i32_0 = arith.constant 0 : i32
    %c0_i32_1 = arith.constant 0 : i32
    return %c0_i32, %c0_i32_0 : i32, i32
  }
  func.func @transform_6(%arg0: i32) -> (i32, i32) {
    %c0_i32 = arith.constant 0 : i32
    %c0_i32_0 = arith.constant 0 : i32
    return %arg0, %c0_i32 : i32, i32
  }
  func.func @transform_7(%arg0: i32) -> (i32, i32) {
    %c0_i32 = arith.constant 0 : i32
    %c0_i32_0 = arith.constant 0 : i32
    return %arg0, %c0_i32 : i32, i32
  }
}

</mosaic_0001>

<bundles_post_ra>
// kernel: tpu_custom_call.1
= control target key start
LH: loop header
LB: loop body
LE: loop exit
PB: predicated region body
PF: predicated region fallthrough
CT: control target
= control target key end

     0   :  { %13 = vsyncpa [#allocation3], 0  ;;  %s1067_s0 = inlined_call_operand.vmem [shape: f32[16,3], index: 0, kind: input, shape index: {}]   ;;  %s1068_s1 = inlined_call_operand.vmem [shape: s32[16,2], index: 1, kind: input, shape index: {}]   ;;  %s1069_s2 = inlined_call_operand.vmem [shape: f32[3,32], index: 2, kind: input, shape index: {}]   ;;  %s1070_s3 = inlined_call_operand.vmem [shape: f32[3,32], index: 3, kind: input, shape index: {}]   ;;  %s1071_s4 = inlined_call_operand.vmem [shape: f32[8,32], index: 4, kind: input, shape index: {}]   ;;  %s1072_s5 = inlined_call_operand.vmem [shape: f32[2,32], index: 5, kind: input, shape index: {}]   ;;  %s1073_s6 = inlined_call_operand.hbm [shape: f32[16,96], index: 6, kind: output, shape index: {0}]   ;;  %s1074_s7 = inlined_call_operand.hbm [shape: f32[16,64], index: 7, kind: output, shape index: {1}]  }
   0x1   :  { %15 = vsyncpa [#allocation3 + $0x1], 0 }
   0x2   :  { %16 = vsyncpa [#allocation5], 0 }
   0x3   :  { %18 = vsyncpa [#allocation5 + $0x1], 0  ;;  %s917_s24 = smov 0   ;;  %s919_s25 = smov 0  }
   0x4   :  { %s921_s26 = smov 0   ;;  %s923_s27 = smov 0  }
   0x5 LB: > { %s938_s28 = sadd.s32 4294967295, %s866_s27   ;;  %s685_s29 = sadd.s32 4294967294, %s866_s27   ;;  %s866_s27 = sphi %s923_s27, %s1086_s27   ;;  %s862_s26 = sphi %s921_s26, %s1085_s26   ;;  %s858_s25 = sphi %s919_s25, %s1084_s25   ;;  %s854_s24 = sphi %s917_s24, %s1083_s24  }
   0x6   : > { %s942_s30 = sadd.s32 1, %s866_s27   ;;  %s167_s8 = sadd.s32 1, %s862_s26 }
   0x7   : > { %s164_s9 = ssub.s32 %s866_s27, %s942_s30  ;;  %p177_p0 = scmp.ne.s32.totalorder %s862_s26, %s858_s25 }
   0x8   : > { %p165_p1 = scmp.eq.s32.totalorder %s164_s9, 0  ;;  %p178_p2 = scmp.eq.s32.totalorder %s938_s28, 1 }
   0x9   : > { %p183_p3 = scmp.ne.s32.totalorder %s858_s25, %s854_s24  ;;  %p184_p4 = scmp.eq.s32.totalorder %s685_s29, 1 }
   0xa   : > { %s953_s10 = scalar_select %p165_p1, %s862_s26, %s167_s8  }
   0xb   : > { %p955_p5 = por %p178_p2, %p177_p0  ;;  %p959_p6 = por %p184_p4, %p183_p3 }
   0xc   : > { %p688_p7 = scmp.ge.s32.totalorder %s866_s27, 1  ;;  %p254_p8 = scmp.lt.s32.totalorder %s866_s27, 3 }
   0xe   : > { %p255_p9 = pnand %p688_p7, %p254_p8 }
   0xf   : > { %p294_p10 = scmp.lt.s32.totalorder (!%p255_p9), %s938_s28, 1  ;;  %s1077_s15 = smov (!%p255_p9), 32  }
  0x10   : > { %258 = sbr.rel (%p255_p9) target bundleno = 476 (0x1dc), region = 44  ;;  %s993_s17 = sand.u32 (!%p255_p9), 1, %s858_s25  }
  0x11   : > { %s1075_s18 = sshll.u32 (!%p255_p9), %s993_s17, 3  ;;  %s1076_s20 = sshll.u32 (!%p255_p9), %s938_s28, 7 }
  0x12   : > { %s567_s23 = scalar_lea.hbm (!%p255_p9), %s1073_s6, %s1076_s20  ;;  %s551_s8 = scalar_lea.sflag (!%p255_p9), [#allocation3], %s993_s17 }
  0x15   : > { %v868_v0 = vmov 1   ;;  %v869_v1 = vmov 0.0   ;;  %s295_s13 = scalar_select %p294_p10, %s938_s28, 1  ;;  %v461_v2 = vld [vmem:[%s1071_s4 + $0x3] sm:$0x1f]  ;;  %vm470_vm0 = vcmask 1044480   ;;  %v310_v8 = vlaneseq }
  0x16   : > { %770 = vset.pattern.permute.xlu0 %v868_v0  ;;  %714 = vmatprep.subr.mxu1 %v869_v1  ;;  %vm870_vm1 = vmmov 0   ;;  %v372_v5 = vld [vmem:[%s1071_s4] sm:$0x7]  ;;  %vm381_vm2 = vcmask 1042432   ;;  %v871_v6 = vmov 0   ;;  %v872_v7 = vmov 2  }
  0x17   : > { %772 = vset.pattern.permute.xlu1 %v868_v0  ;;  %709 = vmatprep.subr.mxu0 %v869_v1  ;;  %s691_s16 = sshll.u32 %s295_s13, 3  ;;  %v311_v9 = vshrl.u32 %v310_v8, 7  ;;  %v303_v11 = vld [vmem:[%s1069_s2] sm:$0x7]  ;;  %v365_v13 = vand.u32 127, %v310_v8  ;;  %vm466_vm3 = vcmask 39936  }
  0x18   : > { %715 = vmatpush3.msk.msra.mxu1 %vm470_vm0, %v461_v2  ;;  %716 = vmatprep.mubr.msk.f32.mxu1 %vm870_vm1, %v869_v1  ;;  %s301_s19 = scalar_lea.vmem %s1068_s1, %s691_s16  ;;  %s297_s22 = scalar_lea.vmem %s1067_s0, %s691_s16  ;;  %v304_v12 = vld [vmem:[%s1070_s3] sm:$0x7]  ;;  %vm377_vm5 = vcmask 23552   ;;  %vm356_vm7 = vcmask 261120   ;;  %vm358_vm8 = vcmask 523264   ;;  %vm360_vm9 = vcmask 785408  }
  0x19   : > { %711 = vmatprep.mubr.msk.f32.mxu0 %vm870_vm1, %v869_v1  ;;  %v362_v3 = vld [vmem:[%s301_s19] sm:$0xff]  ;;  %710 = vmatpush3.msk.msra.mxu0 %vm381_vm2, %v372_v5  ;;  %v979_v10 = vsub.s32 1, %v311_v9  ;;  %v340_v15 = vsub.s32 2, %v311_v9  ;;  %s874_s16 = smov 64   ;;  %v312_v29 = vsub.s32 0, %v311_v9  ;;  %s286_s19 = scalar_lea.vmem [#allocation2], %s1075_s18 }
  0x1a   : > { %v302_v4 = vld [vmem:[%s297_s22] sm:$0xff]  ;;  %456 = vperm.xlu0 %770, %v362_v3   ;;  %s569_s29 = sshll.u32 %s286_s19, 4  ;;  %s875_s13 = smov [#allocation2]   ;;  %s570_s29 = int_to_ptr.vmem [resolvable:$true] %s569_s29 }
  0x1b   : > { %321 = vperm.xlu1 %772, %v302_v4   ;;  %v327_v14 = vrot.slane %v303_v11, %v979_v10  ;;  %v332_v16 = vrot.slane %v304_v12, %v979_v10  ;;  %v341_v21 = vrot.slane %v303_v11, %v340_v15  ;;  %v346_v23 = vrot.slane %v304_v12, %v340_v15  ;;  %s776_s9 = scalar_lea.vmem %s570_s29, 128  ;;  %s780_s14 = sshll.u32 %s875_s13, 4  ;;  %s781_s14 = int_to_ptr.vmem [resolvable:$false] %s780_s14 }
  0x1c   : > { %v313_v30 = vrot.slane %v303_v11, %v312_v29  ;;  %v318_v32 = vrot.slane %v304_v12, %v312_v29  ;;  %p777_p11 = scmp.ne.s32.totalorder %s570_s29, %s776_s9  ;;  %p783_p0 = scmp.lt.s32.totalorder %s570_s29, %s781_s14 }
  0x1e   : > { %771 = vset.pattern.permute.xlu0 %v871_v6  ;;  %p778_p12 = pnand %p777_p11, %p955_p5 }
  0x1f   : > { %773 = vset.pattern.permute.xlu1 %v872_v7  ;;  %367 = vperm.xlu0 %771, %v362_v3  }
  0x20   : > { %335 = vperm.xlu1 %773, %v302_v4   ;;  %p779_p13 = pneg %p778_p12 }
  0x23   : > { %775 = vset.pattern.permute.xlu0 %v868_v0 }
  0x24   : > { %774 = vset.pattern.permute.xlu1 %v871_v6 }
  0x25   : > { %307 = vperm.xlu1 %774, %v302_v4  }
  0x95   : > { %v457_v17 = vpop.permute.xlu0 %456 }
  0x96   : > { %v322_v18 = vpop.permute.xlu1 %321  ;;  %vm458_vm4 = vcmp.eq.s32.totalorder %v457_v17, %v365_v13 }
  0x97   : > { %v328_v19 = vmul.f32 %v327_v14, %v322_v18  ;;  %v696_v20 = vsel %vm458_vm4, 1.0, %v869_v1 }
  0x98   : > { %717 = vmatmul.mubr.msk.f32.vlgmr.msra.gmra.mxu1 %vm466_vm3, %v696_v20 }
  0x99   : > { %v333_v22 = vadd.f32 %v332_v16, %v328_v19 }
  0x9a   : > { %v368_v24 = vpop.permute.xlu0 %367 }
  0x9b   : > { %v336_v25 = vpop.permute.xlu1 %335  ;;  %349 = vrot.lane.b32.xlu0 %v333_v22, %s1077_s15  ;;  %vm369_vm6 = vcmp.eq.s32.totalorder %v368_v24, %v365_v13 }
  0x9c   : > { %v342_v26 = vmul.f32 %v341_v21, %v336_v25  ;;  %v693_v27 = vsel %vm369_vm6, 1.0, %v869_v1 }
  0x9d   : > { %712 = vmatmul.mubr.msk.f32.vlgmr.msra.gmra.mxu0 %vm377_vm5, %v693_v27 }
  0x9e   : > { %v347_v28 = vadd.f32 %v346_v23, %v342_v26 }
  0xa0   : > { %353 = vrot.lane.b32.xlu1 %v347_v28, %s874_s16  ;;  %v308_v31 = vpop.permute.xlu1 %307  ;;  %s782_s16 = scalar_lea.vmem %s781_s14, 256 }
  0xa1   : > { %v314_v33 = vmul.f32 %v313_v30, %v308_v31  ;;  %p784_p1 = scmp.lt.s32.totalorder %s782_s16, %s776_s9 }
  0xa3   : > { %v319_v34 = vadd.f32 %v318_v32, %v314_v33  ;;  %p785_p2 = por %p784_p1, %p783_p0 }
  0xa5   : > { %p786_p3 = pnand %p785_p2, %p779_p13 }
 0x10d   : > { %v350_v35 = vpop.permute.xlu0 %349 }
 0x10e   : > { %v357_v36 = vsel %vm356_vm7, %v319_v34, %v350_v35 }
 0x112   : > { %v354_v37 = vpop.permute.xlu1 %353 }
 0x113   : > { %v359_v38 = vsel %vm358_vm8, %v357_v36, %v354_v37 }
 0x114   : > { %361 = vst.msk [vmem:[%s286_s19] sm:$0xff] %vm360_vm9, %v359_v38 }
 0x115   : > { %789 = shalt.err (!%p786_p3)
}
 0x116   : > { %s790_s18 = scalar_lea.hbm %s567_s23, 128  ;;  %s794_s22 = scalar_lea.hbm %s1073_s6, 256 }
 0x117   : > { %p791_p4 = scmp.ne.s32.totalorder %s567_s23, %s790_s18  ;;  %p795_p9 = scmp.lt.s32.totalorder %s567_s23, %s1073_s6 }
 0x118   : > { %p796_p10 = scmp.lt.s32.totalorder %s794_s22, %s790_s18 }
 0x119   : > { %p792_p7 = pnand %p791_p4, %p955_p5 }
 0x11a   : > { %p797_p11 = por %p796_p10, %p795_p9 }
 0x11b   : > { %p793_p8 = pneg %p792_p7 }
 0x11d   : > { %p798_p12 = pnand %p797_p11, %p793_p8 }
 0x11f   : > { %801 = shalt.err (!%p798_p12)
}
 0x120   : > { %719 = dma.vmem_to_hbm [thread:$0]  (%p955_p5), %s570_s29, 128, %s567_s23, %s551_s8   ;;  %v363_v39 = vld [vmem:[%s1072_s5] sm:$0x3] }
 0x121   : > { %v465_v40 = vrot.slane %v363_v39, %v979_v10  ;;  %v376_v44 = vrot.slane %v363_v39, %v312_v29  ;;  %s1080_s15 = smov 32   ;;  %s1081_s18 = sshll.u32 %s993_s17, 3 }
 0x122   : > { %s293_s20 = scalar_lea.vmem [#allocation4], %s1081_s18  ;;  %s1082_s29 = sshll.u32 %s938_s28, 7 }
 0x123   : > { %s582_s23 = sshll.u32 %s293_s20, 4  ;;  %s1029_s16 = scalar_lea.hbm %s1074_s7, %s1082_s29  ;;  %s583_s23 = int_to_ptr.vmem [resolvable:$true] %s582_s23 }
 0x124   : > { %s556_s19 = scalar_lea.sflag [#allocation5], %s993_s17  ;;  %s802_s21 = scalar_lea.vmem %s583_s23, 128 }
 0x125   : > { %p803_p13 = scmp.ne.s32.totalorder %s583_s23, %s802_s21  ;;  %s876_s22 = smov [#allocation4]  }
 0x126   : > { %s806_s9 = sshll.u32 %s876_s22, 4  ;;  %s807_s9 = int_to_ptr.vmem [resolvable:$false] %s806_s9 }
 0x127   : > { %p804_p0 = pnand %p803_p13, %p955_p5  ;;  %s808_s28 = scalar_lea.vmem %s807_s9, 256 }
 0x128   : > { %p809_p2 = scmp.lt.s32.totalorder %s583_s23, %s807_s9  ;;  %p810_p3 = scmp.lt.s32.totalorder %s808_s28, %s802_s21 }
 0x129   : > { %p805_p1 = pneg %p804_p0 }
 0x12a   : > { %p811_p4 = por %p810_p3, %p809_p2 }
 0x12c   : > { %p812_p7 = pnand %p811_p4, %p805_p1 }
 0x158   : > { %v540_v41 = vpop.f32.mrf.mxu1 }
 0x159   : > { %v541_v42 = vadd.f32 %v540_v41, %v465_v40 }
 0x15a   : > { %v718_v43 = vpop.f32.mrf.mxu1 }
 0x15b   : > { %545 = vrot.lane.b32.xlu0 %v541_v42, %s1080_s15 }
 0x15d   : > { %v451_v45 = vpop.f32.mrf.mxu0 }
 0x15e   : > { %v452_v46 = vadd.f32 %v451_v45, %v376_v44 }
 0x15f   : > { %v713_v47 = vpop.f32.mrf.mxu0 }
 0x1cd   : > { %v546_v48 = vpop.permute.xlu0 %545 }
 0x1ce   : > { %v548_v49 = vsel %vm356_vm7, %v452_v46, %v546_v48 }
 0x1cf   : > { %549 = vst.msk [vmem:[%s293_s20] sm:$0xff] %vm358_vm8, %v548_v49 }
 0x1d0   : > { %815 = shalt.err (!%p812_p7)
}
 0x1d1   : > { %s816_s13 = scalar_lea.hbm %s1029_s16, 128  ;;  %s820_s18 = scalar_lea.hbm %s1074_s7, 256 }
 0x1d2   : > { %p817_p8 = scmp.ne.s32.totalorder %s1029_s16, %s816_s13  ;;  %p821_p11 = scmp.lt.s32.totalorder %s1029_s16, %s1074_s7 }
 0x1d3   : > { %p822_p12 = scmp.lt.s32.totalorder %s820_s18, %s816_s13 }
 0x1d4   : > { %p818_p9 = pnand %p817_p8, %p955_p5 }
 0x1d5   : > { %p823_p13 = por %p822_p12, %p821_p11 }
 0x1d6   : > { %p819_p10 = pneg %p818_p9 }
 0x1d8   : > { %p824_p0 = pnand %p823_p13, %p819_p10 }
 0x1da   : > { %827 = shalt.err (!%p824_p0)
}
 0x1db   : > { %720 = dma.vmem_to_hbm [thread:$0]  (%p955_p5), %s583_s23, 128, %s1029_s16, %s556_s19  }
 0x1dc PF: > { %p730_p1 = scmp.ge.s32.totalorder %s866_s27, 2  ;;  %s594_s8 = sand.u32 1, %s854_s24  }
 0x1dd   : > { %s595_s14 = scalar_lea.sflag [#allocation3], %s594_s8 }
 0x1de   : > { %p724_p2 = pnand %p730_p1, %p959_p6 }
 0x1e0   : > { %p725_p3 = pneg %p724_p2 }
 0x1e2   : > { %845 = dma.done.wait (%p725_p3), %s595_s14, 128  }
 0x1e3   : > { %847 = vsyncadd (%p725_p3), %s595_s14, 4294967168  ;;  %s604_s21 = scalar_lea.sflag [#allocation5], %s594_s8 }
 0x1e4   : > { %849 = dma.done.wait (%p725_p3), %s604_s21, 128  }
 0x1e5   : > { %851 = vsyncadd (%p725_p3), %s604_s21, 4294967168  ;;  %p21_p5 = scmp.ge.s32.totalorder %s942_s30, 4   ;;  %s1083_s24 = smov %s858_s25 }
 0x1e6   : > { %s1084_s25 = smov %s862_s26  ;;  %s1085_s26 = smov %s953_s10 }
 0x1e7   : > { %s1086_s27 = smov %s942_s30  ;;  %23 = sbr.rel (!%p21_p5) target bundleno = 5 (0x5), region = 99 }
 0x1ec   :  { %609 = vsyncpa [#allocation3], 1 }
 0x1ed   :  { %611 = vsyncpa [#allocation3 + $0x1], 1 }
 0x1ee   :  { %612 = vsyncpa [#allocation5], 1 }
 0x1ef   :  { %614 = vsyncpa [#allocation5 + $0x1], 1 }

</bundles_post_ra>
